<compile_context>
chip_gen: v5e
topology: v5e:2x2
jax: 0.10.0
libtpu: 0.0.40
codegen_flags: <defaults>
</compile_context>

<pallas_src>
import functools
from typing import NamedTuple

import jax
import jax.numpy as jnp
from jax.experimental import pallas as pl
from jax.experimental.pallas import tpu as pltpu


# ----------------------------------------------------------------------------
# Chip-aware planning helpers
# ----------------------------------------------------------------------------

class MoEPlan(NamedTuple):
    block_i: int        # tile of the intermediate (inter) axis; == inter => residency
    nbuf: int           # pipeline depth for the expert weight streams
    vmem_limit: int     # vmem_limit_bytes for the pallas_calls


def _vmem_plan():
    """(vmem_limit_bytes, allow_deep_buffering) based on the TPU generation."""
    kind = ""
    try:
        kind = jax.devices()[0].device_kind.lower()
    except Exception:
        pass
    if ("v5" in kind) or ("v6" in kind):
        # v5e/v5p/v6e have 128 MiB VMEM per TensorCore -> use most of it and
        # allow a deeper weight pipeline to hide expert-boundary DMA bursts.
        return 100 * 1024 * 1024, True
    # Conservative default sized for v7x's 64 MiB/TC (also fine on v4 etc.).
    return 48 * 1024 * 1024, False


def _pick_tile(size, cap, align):
    """Largest tile <= cap that divides `size` and is a multiple of `align`;
    fall back to the full dimension (always a legal block size)."""
    if size <= cap:
        return size
    t = (cap // align) * align
    while t >= align:
        if size % t == 0:
            return t
        t -= align
    return size


def _next_pow2(n):
    n = max(int(n), 1)
    return 1 << (n - 1).bit_length()


def _choose_block_t(n_assign, num_experts):
    """Token-block rows: big enough to amortize the ~0.35us/step overhead and
    feed the MXU, small enough that per-expert tail padding stays bounded."""
    per_expert = max(n_assign // max(num_experts, 1), 1)
    bt = max(16, min(512, _next_pow2(per_expert)))
    if n_assign >= 1024:
        bt = max(bt, 64)
    return int(bt)


def _choose_block_i(dim, inter, vmem_budget, allow_deep):
    """Prefer block_i == inter (weight residency across token blocks of the
    same expert); fall back to a 128-aligned tile only if VMEM can't hold it."""
    def weight_bytes(bi, nbuf):
        # fused w13 tile (dim x 2*bi) + w2 tile (bi x dim), bf16, nbuf buffers
        return nbuf * (dim * 2 * bi + bi * dim) * 2

    # non-weight VMEM, assuming the largest block_t we ever pick (512):
    other = 512 * dim * (2 * 2 + 4 + 2 * 2)   # x dbl-buf + f32 acc + out dbl-buf
    usable = int(vmem_budget * 0.85) - other

    for nbuf in ((3, 2) if allow_deep else (2,)):
        if weight_bytes(inter, nbuf) <= usable:
            return inter, nbuf
    bi = (inter // 128) * 128
    while bi >= 128:
        if inter % bi == 0 and weight_bytes(bi, 2) <= usable:
            return bi, 2
        bi -= 128
    return inter, 2


def _weight_spec(shape, index_map, nbuf):
    """BlockSpec for the expert weight streams, optionally with a deeper
    pipeline (pl.Buffered) to hide the burst DMA at expert boundaries."""
    if nbuf > 2 and hasattr(pl, "Buffered"):
        try:
            return pl.BlockSpec(shape, index_map, pipeline_mode=pl.Buffered(nbuf))
        except TypeError:   # older BlockSpec without pipeline_mode
            pass
    return pl.BlockSpec(shape, index_map)


# ----------------------------------------------------------------------------
# Tiled linear kernel:  y = x @ w      (w already transposed to [K, N])
# ----------------------------------------------------------------------------

def _linear_kernel(x_ref, w_ref, o_ref, acc_ref):
    @pl.when(pl.program_id(2) == 0)
    def _():
        acc_ref[...] = jnp.zeros_like(acc_ref)

    acc_ref[...] += jnp.dot(x_ref[...], w_ref[...],
                            preferred_element_type=jnp.float32)

    @pl.when(pl.program_id(2) == pl.num_programs(2) - 1)
    def _():
        o_ref[...] = acc_ref[...].astype(o_ref.dtype)


def linear(x, w, out_dtype=None, tm=256, tn=256, tk=512,
           vmem_limit=48 * 1024 * 1024):
    M, K = x.shape
    K2, N = w.shape
    assert K == K2
    out_dtype = out_dtype or x.dtype
    tm = _pick_tile(M, tm, 8)
    tn = _pick_tile(N, tn, 256 if N % 256 == 0 else 128)
    tk = _pick_tile(K, tk, 256 if K % 256 == 0 else 128)
    grid = (M // tm, N // tn, K // tk)
    return pl.pallas_call(
        _linear_kernel,
        grid_spec=pltpu.PrefetchScalarGridSpec(
            num_scalar_prefetch=0,
            grid=grid,
            in_specs=[
                pl.BlockSpec((tm, tk), lambda i, j, k: (i, k)),
                pl.BlockSpec((tk, tn), lambda i, j, k: (k, j)),
            ],
            out_specs=pl.BlockSpec((tm, tn), lambda i, j, k: (i, j)),
            scratch_shapes=[pltpu.VMEM((tm, tn), jnp.float32)],
        ),
        out_shape=jax.ShapeDtypeStruct((M, N), out_dtype),
        compiler_params=pltpu.CompilerParams(
            dimension_semantics=("parallel", "parallel", "arbitrary"),
            vmem_limit_bytes=vmem_limit),
    )(x, w)


# ----------------------------------------------------------------------------
# Grouped (group-by-expert) MoE FFN kernel
# ----------------------------------------------------------------------------

def _grouped_ffn_kernel(be_ref, nb_ref, x_ref, w13_ref, w2_ref, o_ref, acc_ref,
                        *, block_i):
    # be_ref: SMEM (G,) block -> expert map (used only by the index_maps).
    # nb_ref: SMEM (1,) number of REAL (non-padding) token blocks.
    g = pl.program_id(0)
    it = pl.program_id(1)
    real = g < nb_ref[0]

    @pl.when(jnp.logical_and(real, it == 0))
    def _():
        acc_ref[...] = jnp.zeros_like(acc_ref)

    @pl.when(real)
    def _():
        x = x_ref[...]                       # (BT, dim)        bf16
        w13 = w13_ref[0]                     # (dim, 2*BI)      bf16  [w1 | w3]
        w2 = w2_ref[0]                       # (BI, dim)        bf16
        h = jnp.dot(x, w13, preferred_element_type=jnp.float32)   # (BT, 2*BI)
        x1 = h[:, :block_i]
        x3 = h[:, block_i:]
        act = (x1 * jax.nn.sigmoid(x1)) * x3                       # silu(x1)*x3
        acc_ref[...] += jnp.dot(act.astype(w2.dtype), w2,
                                preferred_element_type=jnp.float32)

    @pl.when(jnp.logical_and(real, it == pl.num_programs(1) - 1))
    def _():
        o_ref[...] = acc_ref[...].astype(o_ref.dtype)


def grouped_expert_ffn(x_pad, block_expert, nblocks, w13, w2t, *,
                       block_t, block_i, nbuf, vmem_limit):
    """x_pad: [P, dim] tokens grouped by expert (P = G*block_t, G static bound);
    block_expert: [G] int32 block -> expert; nblocks: [1] int32 real block count;
    w13: [E, dim, 2*inter] fused+transposed up-proj; w2t: [E, inter, dim]."""
    P, dim = x_pad.shape
    E, _, two_inter = w13.shape
    inter = two_inter // 2
    G = P // block_t
    IT = inter // block_i

    def clamp(g, nb):
        return jnp.minimum(g, nb[0] - 1)

    x_spec = pl.BlockSpec((block_t, dim), lambda g, k, be, nb: (clamp(g, nb), 0))
    w13_spec = _weight_spec((1, dim, 2 * block_i),
                            lambda g, k, be, nb: (be[clamp(g, nb)], 0, k), nbuf)
    w2_spec = _weight_spec((1, block_i, dim),
                           lambda g, k, be, nb: (be[clamp(g, nb)], k, 0), nbuf)
    # Output index is NOT clamped: padding blocks write (never-read) rows of
    # their own, which keeps the scheme safe under a megacore "parallel" split.
    out_spec = pl.BlockSpec((block_t, dim), lambda g, k, be, nb: (g, 0))

    grid_spec = pltpu.PrefetchScalarGridSpec(
        num_scalar_prefetch=2,
        grid=(G, IT),
        in_specs=[x_spec, w13_spec, w2_spec],
        out_specs=out_spec,
        scratch_shapes=[pltpu.VMEM((block_t, dim), jnp.float32)],
    )
    kernel = functools.partial(_grouped_ffn_kernel, block_i=block_i)
    return pl.pallas_call(
        kernel,
        grid_spec=grid_spec,
        out_shape=jax.ShapeDtypeStruct((P, dim), x_pad.dtype),
        compiler_params=pltpu.CompilerParams(
            dimension_semantics=("parallel", "arbitrary"),
            vmem_limit_bytes=vmem_limit),
    )(block_expert, nblocks, x_pad, w13, w2t)


# ----------------------------------------------------------------------------
# JAX glue: routing + group-by-expert bucketing (static shapes via padding)
# ----------------------------------------------------------------------------

def _route_and_group(ei, ew, num_experts, block_t):
    """Sort (token, expert) assignments by expert and pad each expert's group
    to a multiple of block_t so every block maps to exactly one expert."""
    T, A = ei.shape
    N = T * A

    flat_e = ei.reshape(N).astype(jnp.int32)
    flat_t = jnp.arange(N, dtype=jnp.int32) // A
    flat_w = ew.reshape(N).astype(jnp.float32)

    order = jnp.argsort(flat_e)                 # stable
    se = flat_e[order]
    st = flat_t[order]
    sw = flat_w[order]

    counts = jnp.zeros((num_experts,), jnp.int32).at[flat_e].add(1)
    group_start = jnp.cumsum(counts) - counts
    blocks_per_e = (counts + block_t - 1) // block_t
    cum_blocks = jnp.cumsum(blocks_per_e)
    padded_start = (cum_blocks - blocks_per_e) * block_t

    within = jnp.arange(N, dtype=jnp.int32) - group_start[se]
    dest = padded_start[se] + within            # unique padded row per assignment

    # Static upper bound:  sum_e ceil(c_e / B) <= ceil(N / B) + E
    G = -(-N // block_t) + num_experts
    block_ids = jnp.arange(G, dtype=jnp.int32)
    block_expert = jnp.minimum(
        jnp.searchsorted(cum_blocks, block_ids, side="right"),
        num_experts - 1).astype(jnp.int32)
    nblocks = cum_blocks[-1].astype(jnp.int32).reshape(1)

    return st, sw, dest, block_expert, nblocks, G


# ----------------------------------------------------------------------------
# Parameter preparation (done ONCE) + forward pass
# ----------------------------------------------------------------------------

def prepare_moe_params(params):
    """Transpose/fuse the expert weights into MXU-friendly layouts and pick the
    chip-specific tiling plan. Call once; reuse for every forward."""
    gate, w1, w2, w3 = params["gate"], params["w1"], params["w2"], params["w3"]
    E, inter, dim = w1.shape
    vmem_limit, allow_deep = _vmem_plan()
    block_i, nbuf = _choose_block_i(dim, inter, vmem_limit, allow_deep)
    IT = inter // block_i

    w1t = jnp.transpose(w1, (0, 2, 1))          # [E, dim, inter]
    w3t = jnp.transpose(w3, (0, 2, 1))          # [E, dim, inter]
    # Interleave per inter-tile so fused column block k = [w1 tile k | w3 tile k].
    w13 = jnp.concatenate(
        [w1t.reshape(E, dim, IT, block_i), w3t.reshape(E, dim, IT, block_i)],
        axis=3).reshape(E, dim, 2 * inter)      # [E, dim, 2*inter]
    w2t = jnp.transpose(w2, (0, 2, 1))          # [E, inter, dim]

    E_pad = -(-E // 128) * 128                  # lane-dense gate output
    gate_t = jnp.transpose(gate, (1, 0))        # [dim, E]
    gate_t = jnp.pad(gate_t, ((0, 0), (0, E_pad - E)))

    weights = dict(gate_t=gate_t, w13=w13, w2t=w2t)
    plan = MoEPlan(block_i=block_i, nbuf=nbuf, vmem_limit=vmem_limit)
    return weights, plan


def moe_feed_forward(weights, x, *, plan, num_activated):
    """Pallas implementation of MOEFeedForward.forward.  x: [T, dim]."""
    T, dim = x.shape
    E = weights["w13"].shape[0]
    A = num_activated

    # ---- routing (gate matmul in Pallas; softmax/top-k in JAX glue) ----
    scores = linear(x, weights["gate_t"], out_dtype=jnp.float32,
                    vmem_limit=plan.vmem_limit)[:, :E]               # [T, E]
    probs = jax.nn.softmax(scores, axis=-1)
    ew, ei = jax.lax.top_k(probs, A)                                  # [T, A]
    ew = ew / jnp.sum(ew, axis=-1, keepdims=True)                     # f32

    # ---- group tokens by expert (padded, static shapes) ----
    block_t = _choose_block_t(T * A, E)
    st, sw, dest, block_expert, nblocks, G = _route_and_group(ei, ew, E, block_t)
    P = G * block_t
    # TODO(synk): drive this token gather from an in-kernel DMA (scalar-prefetched
    # row table) instead of materializing x_pad in HBM.
    x_pad = jnp.zeros((P, dim), x.dtype).at[dest].set(x[st])

    # ---- grouped expert FFN (weights read in place from [E, ...] layouts) ----
    y_pad = grouped_expert_ffn(x_pad, block_expert, nblocks,
                               weights["w13"], weights["w2t"],
                               block_t=block_t, block_i=plan.block_i,
                               nbuf=plan.nbuf, vmem_limit=plan.vmem_limit)

    # ---- combine: gather the real rows, weight in f32, scatter-add per token ----
    y = y_pad[dest].astype(jnp.float32) * sw[:, None]
    out = jnp.zeros((T, dim), jnp.float32).at[st].add(y)
    return out.astype(x.dtype)


# ----------------------------------------------------------------------------
# Pure-JAX reference (mirrors the PyTorch module, f32)
# ----------------------------------------------------------------------------

def moe_reference(params, x, num_activated):
    xf = x.astype(jnp.float32)
    gw = params["gate"].astype(jnp.float32)
    w1 = params["w1"].astype(jnp.float32)
    w2 = params["w2"].astype(jnp.float32)
    w3 = params["w3"].astype(jnp.float32)

    scores = xf @ gw.T
    probs = jax.nn.softmax(scores, axis=-1)
    ew, ei = jax.lax.top_k(probs, num_activated)
    ew = ew / jnp.sum(ew, axis=-1, keepdims=True)

    x1 = jax.nn.silu(jnp.einsum("ti,taoi->tao", xf, w1[ei]))
    x3 = jnp.einsum("ti,taoi->tao", xf, w3[ei])
    eo = jnp.einsum("tao,taio->tai", x1 * x3, w2[ei])
    return jnp.einsum("tai,ta->ti", eo, ew)


# ----------------------------------------------------------------------------
# Main
# ----------------------------------------------------------------------------

if __name__ == "__main__":
    cfg = dict(
        dim=128,
        num_experts=8,
        num_activated_experts=2,
        moe_intermediate_size=128,
    )
    # MOEFeedForward flattens [batch, seq, dim] -> [T, dim]; batch=2, seq=8.
    T = 16
    dt = jnp.bfloat16   # bf16 operands, f32 accumulation inside the kernels

    key = jax.random.PRNGKey(0)
    kx, kg, k1, k2, k3 = jax.random.split(key, 5)
    x = jax.random.normal(kx, (T, cfg["dim"]), jnp.float32).astype(dt)
    params = dict(
        gate=(0.05 * jax.random.normal(
            kg, (cfg["num_experts"], cfg["dim"]), jnp.float32)).astype(dt),
        w1=(0.05 * jax.random.normal(
            k1, (cfg["num_experts"], cfg["moe_intermediate_size"], cfg["dim"]),
            jnp.float32)).astype(dt),
        w2=(0.05 * jax.random.normal(
            k2, (cfg["num_experts"], cfg["dim"], cfg["moe_intermediate_size"]),
            jnp.float32)).astype(dt),
        w3=(0.05 * jax.random.normal(
            k3, (cfg["num_experts"], cfg["moe_intermediate_size"], cfg["dim"]),
            jnp.float32)).astype(dt),
    )

    weights, plan = prepare_moe_params(params)
    fwd = jax.jit(functools.partial(
        moe_feed_forward, plan=plan,
        num_activated=cfg["num_activated_experts"]))
    out = jax.block_until_ready(fwd(weights, x))

    ref = moe_reference(params, x, cfg["num_activated_experts"])

    assert out.shape == (T, cfg["dim"])
    assert bool(jnp.all(jnp.isfinite(out)))
    max_err = float(jnp.max(jnp.abs(out.astype(jnp.float32) - ref)))
    assert max_err < 3e-2, f"max abs err {max_err}"
    print("KERNEL_OK")
</pallas_src>

<mosaic_0001>
module attributes {stable_mosaic.version = 11 : i64} {
  func.func @_linear_kernel(%arg0: i32, %arg1: i32, %arg2: i32, %arg3: memref<16x128xbf16, #tpu.memory_space<vmem>>, %arg4: memref<128x128xbf16, #tpu.memory_space<vmem>>, %arg5: memref<16x128xf32, #tpu.memory_space<vmem>>, %arg6: memref<16x128xf32, #tpu.memory_space<vmem>>) attributes {dimension_semantics = [#tpu.dimension_semantics<parallel>, #tpu.dimension_semantics<parallel>, #tpu.dimension_semantics<arbitrary>], iteration_bounds = array<i64: 1, 1, 1>, scalar_prefetch = 0 : i64, scratch_operands = 1 : i64, tpu.core_type = #tpu.core_type<tc>, window_params = [{transform_indices = @transform_0, window_bounds = array<i64: 16, 128>}, {transform_indices = @transform_1, window_bounds = array<i64: 128, 128>}, {transform_indices = @transform_2, window_bounds = array<i64: 16, 128>}]} {
    %c0_i32 = arith.constant 0 : i32
    %0 = arith.cmpi eq, %arg2, %c0_i32 : i32
    %1 = arith.extui %0 : i1 to i32
    %c0_i32_0 = arith.constant 0 : i32
    %2 = arith.cmpi ne, %1, %c0_i32_0 : i32
    scf.if %2 {
      %cst_10 = arith.constant 0.000000e+00 : f32
      %12 = vector.broadcast %cst_10 : f32 to vector<16x128xf32>
      %c0_11 = arith.constant 0 : index
      %c0_12 = arith.constant 0 : index
      %13 = vector.load %arg6[%c0_11, %c0_12] : memref<16x128xf32, #tpu.memory_space<vmem>>, vector<16x128xf32>
      tpu.vector_store %arg6[%c0_11, %c0_12], %12 {strides = array<i32>} : memref<16x128xf32, #tpu.memory_space<vmem>>, vector<16x128xf32>,
    } else {
    }
    %c0 = arith.constant 0 : index
    %c0_1 = arith.constant 0 : index
    %3 = vector.load %arg6[%c0, %c0_1] : memref<16x128xf32, #tpu.memory_space<vmem>>, vector<16x128xf32>
    %c0_2 = arith.constant 0 : index
    %c0_3 = arith.constant 0 : index
    %4 = vector.load %arg3[%c0_2, %c0_3] : memref<16x128xbf16, #tpu.memory_space<vmem>>, vector<16x128xbf16>
    %c0_4 = arith.constant 0 : index
    %c0_5 = arith.constant 0 : index
    %5 = vector.load %arg4[%c0_4, %c0_5] : memref<128x128xbf16, #tpu.memory_space<vmem>>, vector<128x128xbf16>
    %cst = arith.constant dense<0.000000e+00> : vector<16x128xf32>
    %6 = tpu.matmul %4, %5, %cst {dimension_numbers = #tpu.dot_dimension_numbers<[1], [0], [0], [1], [0, 0, 1, 1], [], []>} : vector<16x128xbf16>, vector<128x128xbf16>, vector<16x128xf32> -> vector<16x128xf32>
    %7 = arith.addf %3, %6 : vector<16x128xf32>
    %c0_6 = arith.constant 0 : index
    %c0_7 = arith.constant 0 : index
    %8 = vector.load %arg6[%c0_6, %c0_7] : memref<16x128xf32, #tpu.memory_space<vmem>>, vector<16x128xf32>
    tpu.vector_store %arg6[%c0_6, %c0_7], %7 {strides = array<i32>} : memref<16x128xf32, #tpu.memory_space<vmem>>, vector<16x128xf32>,
    %c0_i32_8 = arith.constant 0 : i32
    %9 = arith.cmpi eq, %arg2, %c0_i32_8 : i32
    %10 = arith.extui %9 : i1 to i32
    %c0_i32_9 = arith.constant 0 : i32
    %11 = arith.cmpi ne, %10, %c0_i32_9 : i32
    scf.if %11 {
      %c0_10 = arith.constant 0 : index
      %c0_11 = arith.constant 0 : index
      %12 = vector.load %arg6[%c0_10, %c0_11] : memref<16x128xf32, #tpu.memory_space<vmem>>, vector<16x128xf32>
      %c0_12 = arith.constant 0 : index
      %c0_13 = arith.constant 0 : index
      %13 = vector.load %arg5[%c0_12, %c0_13] : memref<16x128xf32, #tpu.memory_space<vmem>>, vector<16x128xf32>
      tpu.vector_store %arg5[%c0_12, %c0_13], %12 {strides = array<i32>} : memref<16x128xf32, #tpu.memory_space<vmem>>, vector<16x128xf32>,
    } else {
    }
    return
  }
  func.func @transform_0(%arg0: i32, %arg1: i32, %arg2: i32) -> (i32, i32) {
    %c0_i32 = arith.constant 0 : i32
    return %arg0, %arg2 : i32, i32
  }
  func.func @transform_1(%arg0: i32, %arg1: i32, %arg2: i32) -> (i32, i32) {
    %c0_i32 = arith.constant 0 : i32
    return %arg2, %arg1 : i32, i32
  }
  func.func @transform_2(%arg0: i32, %arg1: i32, %arg2: i32) -> (i32, i32) {
    %c0_i32 = arith.constant 0 : i32
    return %arg0, %arg1 : i32, i32
  }
}

module attributes {stable_mosaic.version = 11 : i64} {
  func.func @_grouped_ffn_kernel(%arg0: i32, %arg1: i32, %arg2: memref<10xi32, #tpu.memory_space<smem>>, %arg3: memref<1xi32, #tpu.memory_space<smem>>, %arg4: memref<16x128xbf16, #tpu.memory_space<vmem>>, %arg5: memref<1x128x256xbf16, #tpu.memory_space<vmem>>, %arg6: memref<1x128x128xbf16, #tpu.memory_space<vmem>>, %arg7: memref<16x128xbf16, #tpu.memory_space<vmem>>, %arg8: memref<16x128xf32, #tpu.memory_space<vmem>>) attributes {dimension_semantics = [#tpu.dimension_semantics<parallel>, #tpu.dimension_semantics<arbitrary>], iteration_bounds = array<i64: 10, 1>, scalar_prefetch = 2 : i64, scratch_operands = 1 : i64, tpu.core_type = #tpu.core_type<tc>, window_params = [{transform_indices = @transform_0, window_bounds = array<i64: 16, 128>}, {transform_indices = @transform_1, window_bounds = array<i64: 1, 128, 256>}, {transform_indices = @transform_2, window_bounds = array<i64: 1, 128, 128>}, {transform_indices = @transform_3, window_bounds = array<i64: 16, 128>}]} {
    %c0 = arith.constant 0 : index
    %0 = memref.load %arg3[%c0] : memref<1xi32, #tpu.memory_space<smem>>
    %1 = arith.cmpi slt, %arg0, %0 : i32
    %c0_i32 = arith.constant 0 : i32
    %2 = arith.cmpi eq, %arg1, %c0_i32 : i32
    %3 = arith.andi %1, %2 : i1
    %4 = arith.extui %3 : i1 to i32
    %c0_i32_0 = arith.constant 0 : i32
    %5 = arith.cmpi ne, %4, %c0_i32_0 : i32
    scf.if %5 {
      %cst = arith.constant 0.000000e+00 : f32
      %12 = vector.broadcast %cst : f32 to vector<16x128xf32>
      %c0_4 = arith.constant 0 : index
      %c0_5 = arith.constant 0 : index
      %13 = vector.load %arg8[%c0_4, %c0_5] : memref<16x128xf32, #tpu.memory_space<vmem>>, vector<16x128xf32>
      tpu.vector_store %arg8[%c0_4, %c0_5], %12 {strides = array<i32>} : memref<16x128xf32, #tpu.memory_space<vmem>>, vector<16x128xf32>,
    } else {
    }
    %6 = arith.extui %1 : i1 to i32
    %c0_i32_1 = arith.constant 0 : i32
    %7 = arith.cmpi ne, %6, %c0_i32_1 : i32
    scf.if %7 {
      %c0_4 = arith.constant 0 : index
      %c0_5 = arith.constant 0 : index
      %12 = vector.load %arg4[%c0_4, %c0_5] : memref<16x128xbf16, #tpu.memory_space<vmem>>, vector<16x128xbf16>
      %c0_6 = arith.constant 0 : index
      %c0_7 = arith.constant 0 : index
      %c0_8 = arith.constant 0 : index
      %13 = vector.load %arg5[%c0_6, %c0_7, %c0_8] : memref<1x128x256xbf16, #tpu.memory_space<vmem>>, vector<1x128x256xbf16>
      %14 = vector.shape_cast %13 : vector<1x128x256xbf16> to vector<128x256xbf16>
      %c0_9 = arith.constant 0 : index
      %c0_10 = arith.constant 0 : index
      %c0_11 = arith.constant 0 : index
      %15 = vector.load %arg6[%c0_9, %c0_10, %c0_11] : memref<1x128x128xbf16, #tpu.memory_space<vmem>>, vector<1x128x128xbf16>
      %16 = vector.shape_cast %15 : vector<1x128x128xbf16> to vector<128x128xbf16>
      %cst = arith.constant dense<0.000000e+00> : vector<16x256xf32>
      %17 = tpu.matmul %12, %14, %cst {dimension_numbers = #tpu.dot_dimension_numbers<[1], [0], [0], [1], [0, 0, 1, 1], [], []>} : vector<16x128xbf16>, vector<128x256xbf16>, vector<16x256xf32> -> vector<16x256xf32>
      %18 = vector.extract_strided_slice %17 {offsets = [0, 0], sizes = [16, 128], strides = [1, 1]} : vector<16x256xf32> to vector<16x128xf32>
      %19 = vector.extract_strided_slice %17 {offsets = [0, 128], sizes = [16, 128], strides = [1, 1]} : vector<16x256xf32> to vector<16x128xf32>
      %20 = arith.negf %18 : vector<16x128xf32>
      %21 = math.exp %20 : vector<16x128xf32>
      %cst_12 = arith.constant 1.000000e+00 : f32
      %22 = vector.broadcast %cst_12 : f32 to vector<16x128xf32>
      %23 = arith.addf %22, %21 : vector<16x128xf32>
      %24 = arith.divf %22, %23 : vector<16x128xf32>
      %25 = arith.mulf %18, %24 : vector<16x128xf32>
      %26 = arith.mulf %25, %19 : vector<16x128xf32>
      %c0_13 = arith.constant 0 : index
      %c0_14 = arith.constant 0 : index
      %27 = vector.load %arg8[%c0_13, %c0_14] : memref<16x128xf32, #tpu.memory_space<vmem>>, vector<16x128xf32>
      %28 = arith.truncf %26 : vector<16x128xf32> to vector<16x128xbf16>
      %cst_15 = arith.constant dense<0.000000e+00> : vector<16x128xf32>
      %29 = tpu.matmul %28, %16, %cst_15 {dimension_numbers = #tpu.dot_dimension_numbers<[1], [0], [0], [1], [0, 0, 1, 1], [], []>} : vector<16x128xbf16>, vector<128x128xbf16>, vector<16x128xf32> -> vector<16x128xf32>
      %30 = arith.addf %27, %29 : vector<16x128xf32>
      %c0_16 = arith.constant 0 : index
      %c0_17 = arith.constant 0 : index
      %31 = vector.load %arg8[%c0_16, %c0_17] : memref<16x128xf32, #tpu.memory_space<vmem>>, vector<16x128xf32>
      tpu.vector_store %arg8[%c0_16, %c0_17], %30 {strides = array<i32>} : memref<16x128xf32, #tpu.memory_space<vmem>>, vector<16x128xf32>,
    } else {
    }
    %c0_i32_2 = arith.constant 0 : i32
    %8 = arith.cmpi eq, %arg1, %c0_i32_2 : i32
    %9 = arith.andi %1, %8 : i1
    %10 = arith.extui %9 : i1 to i32
    %c0_i32_3 = arith.constant 0 : i32
    %11 = arith.cmpi ne, %10, %c0_i32_3 : i32
    scf.if %11 {
      %c0_4 = arith.constant 0 : index
      %c0_5 = arith.constant 0 : index
      %12 = vector.load %arg8[%c0_4, %c0_5] : memref<16x128xf32, #tpu.memory_space<vmem>>, vector<16x128xf32>
      %13 = arith.truncf %12 : vector<16x128xf32> to vector<16x128xbf16>
      %c0_6 = arith.constant 0 : index
      %c0_7 = arith.constant 0 : index
      %14 = vector.load %arg7[%c0_6, %c0_7] : memref<16x128xbf16, #tpu.memory_space<vmem>>, vector<16x128xbf16>
      tpu.vector_store %arg7[%c0_6, %c0_7], %13 {strides = array<i32>} : memref<16x128xbf16, #tpu.memory_space<vmem>>, vector<16x128xbf16>,
    } else {
    }
    return
  }
  func.func @transform_0(%arg0: i32, %arg1: i32, %arg2: memref<10xi32, #tpu.memory_space<smem>>, %arg3: memref<1xi32, #tpu.memory_space<smem>>) -> (i32, i32) {
    %c0 = arith.constant 0 : index
    %0 = memref.load %arg3[%c0] : memref<1xi32, #tpu.memory_space<smem>>
    %c1_i32 = arith.constant 1 : i32
    %1 = arith.subi %0, %c1_i32 : i32
    %2 = arith.minsi %arg0, %1 : i32
    %c0_i32 = arith.constant 0 : i32
    %c0_i32_0 = arith.constant 0 : i32
    return %2, %c0_i32 : i32, i32
  }
  func.func @transform_1(%arg0: i32, %arg1: i32, %arg2: memref<10xi32, #tpu.memory_space<smem>>, %arg3: memref<1xi32, #tpu.memory_space<smem>>) -> (i32, i32, i32) {
    %c0 = arith.constant 0 : index
    %0 = memref.load %arg3[%c0] : memref<1xi32, #tpu.memory_space<smem>>
    %c1_i32 = arith.constant 1 : i32
    %1 = arith.subi %0, %c1_i32 : i32
    %2 = arith.minsi %arg0, %1 : i32
    %3 = arith.index_cast %2 : i32 to index
    %4 = memref.load %arg2[%3] : memref<10xi32, #tpu.memory_space<smem>>
    %c0_i32 = arith.constant 0 : i32
    %c0_i32_0 = arith.constant 0 : i32
    return %4, %c0_i32, %arg1 : i32, i32, i32
  }
  func.func @transform_2(%arg0: i32, %arg1: i32, %arg2: memref<10xi32, #tpu.memory_space<smem>>, %arg3: memref<1xi32, #tpu.memory_space<smem>>) -> (i32, i32, i32) {
    %c0 = arith.constant 0 : index
    %0 = memref.load %arg3[%c0] : memref<1xi32, #tpu.memory_space<smem>>
    %c1_i32 = arith.constant 1 : i32
    %1 = arith.subi %0, %c1_i32 : i32
    %2 = arith.minsi %arg0, %1 : i32
    %3 = arith.index_cast %2 : i32 to index
    %4 = memref.load %arg2[%3] : memref<10xi32, #tpu.memory_space<smem>>
    %c0_i32 = arith.constant 0 : i32
    %c0_i32_0 = arith.constant 0 : i32
    return %4, %arg1, %c0_i32 : i32, i32, i32
  }
  func.func @transform_3(%arg0: i32, %arg1: i32, %arg2: memref<10xi32, #tpu.memory_space<smem>>, %arg3: memref<1xi32, #tpu.memory_space<smem>>) -> (i32, i32) {
    %c0_i32 = arith.constant 0 : i32
    %c0_i32_0 = arith.constant 0 : i32
    return %arg0, %c0_i32 : i32, i32
  }
}

</mosaic_0001>

<bundles_post_ra>
// kernel: custom-call
= control target key start
LH: loop header
LB: loop body
LE: loop exit
PB: predicated region body
PF: predicated region fallthrough
CT: control target
= control target key end

     0   :  { %s6_s0 = inlined_call_operand.vmem [shape: u32[10], index: 0, kind: output, shape index: {}]  }

// kernel: ne.0
= control target key start
LH: loop header
LB: loop body
LE: loop exit
PB: predicated region body
PF: predicated region fallthrough
CT: control target
= control target key end

     0   :  { %s20_s0 = inlined_call_operand.<no memory space> [shape: s32[], index: 0, kind: input, shape index: {}]   ;;  %s21_s1 = inlined_call_operand.vmem [shape: s32[32], index: 1, kind: output, shape index: {}]  }
   0x1   :  { %v2_v0 = vstv %s20_s0 }
   0x2   :  { %3 = vst [vmem:[%s21_s1] sm:$0x1] %v2_v0 }

// kernel: moe_feed_forward.2
= control target key start
LH: loop header
LB: loop body
LE: loop exit
PB: predicated region body
PF: predicated region fallthrough
CT: control target
= control target key end

     0   :  { %7 = vsyncpa [#allocation4], 0  ;;  %s286_s0 = inlined_call_operand.hbm [shape: bf16[16,128], index: 0, kind: input, shape index: {}]   ;;  %s287_s1 = inlined_call_operand.hbm [shape: bf16[128,128], index: 1, kind: input, shape index: {}]   ;;  %s288_s2 = inlined_call_operand.vmem [shape: f32[16,128], index: 2, kind: output, shape index: {}]  }
   0x1   :  { %s13_s11 = sshll.u32 %s286_s0, 4  ;;  %s14_s11 = int_to_ptr.hbm [resolvable:$true] %s13_s11 }
   0x2   :  { %8 = vsyncpa [#allocation6], 0  ;;  %s255_s12 = smov [#allocation3]   ;;  %s26_s16 = sshll.u32 %s287_s1, 4  ;;  %s27_s16 = int_to_ptr.hbm [resolvable:$true] %s26_s16 }
   0x3   :  { %s15_s13 = sshll.u32 %s255_s12, 4  ;;  %s256_s17 = smov 64   ;;  %s16_s13 = int_to_ptr.vmem [resolvable:$true] %s15_s13 }
   0x4   :  { %s257_s18 = smov 4   ;;  %s258_s19 = smov [#allocation5]  }
   0x5   :  { %21 = dma.hbm_to_vmem [thread:$0]  %s14_s11, 128, %s16_s13, [#allocation4], %s256_s17, %s256_s17, %s257_s18  }
   0x6   :  { %s28_s20 = sshll.u32 %s258_s19, 4  ;;  %s29_s20 = int_to_ptr.vmem [resolvable:$true] %s28_s20 }
   0x7   :  { %34 = dma.hbm_to_vmem [thread:$0]  %s27_s16, 1024, %s29_s20, [#allocation6], %s256_s17, %s256_s17, %s257_s18  }
   0x8   :  { %251 = dma.done.wait [#allocation4], 128  }
   0x9   :  { %252 = vsyncadd [#allocation4], 4294967168 }
   0xa   :  { %253 = dma.done.wait [#allocation6], 1024  }
   0xb   :  { %254 = vsyncadd [#allocation6], 4294966272  ;;  %v198_v0 = vld [vmem:[#allocation5 + $0x38] sm:$0xff]  ;;  %v197_v1 = vld [vmem:[#allocation5 + $0x30] sm:$0xff] }
   0xc   :  { %123 = vmatpush.bf16.msra.mxu0 %v198_v0  ;;  %v196_v2 = vld [vmem:[#allocation5 + $0x28] sm:$0xff]  ;;  %v195_v3 = vld [vmem:[#allocation5 + $0x20] sm:$0xff]  ;;  %v194_v4 = vld [vmem:[#allocation5 + $0x18] sm:$0xff] }
   0xd   :  { %v193_v5 = vld [vmem:[#allocation5 + $0x10] sm:$0xff]  ;;  %v192_v6 = vld [vmem:[#allocation5 + $0x8] sm:$0xff]  ;;  %v191_v7 = vld [vmem:[#allocation5] sm:$0xff] }
   0xe   :  { %v190_v8 = vld [vmem:[#allocation3] sm:$0xff] }
  0x10   :  { %124 = vmatpush.bf16.msra.mxu0 %v197_v1 }
  0x14   :  { %125 = vmatpush.bf16.msra.mxu0 %v196_v2 }
  0x18   :  { %126 = vmatpush.bf16.msra.mxu0 %v195_v3 }
  0x1c   :  { %127 = vmatpush.bf16.msra.mxu0 %v194_v4 }
  0x20   :  { %128 = vmatpush.bf16.msra.mxu0 %v193_v5 }
  0x24   :  { %129 = vmatpush.bf16.msra.mxu0 %v192_v6 }
  0x28   :  { %130 = vmatpush.bf16.msra.mxu0 %v191_v7 }
  0x2b   :  { %131 = vmatmul.bf16.vlgmr.msra.gmra.mxu0 %v190_v8 }
  0xa8   :  { %v132_v9 = vpop.f32.mrf.mxu0 }
  0xa9   :  { %146 = vst [vmem:[%s288_s2] sm:$0xff] %v132_v9 }
  0xb0   :  { %v134_v10 = vpop.f32.mrf.mxu0 }
  0xb1   :  { %147 = vst [vmem:[%s288_s2 + $0x8] sm:$0xff] %v134_v10 }
  0xb2   :  { %152 = vsyncpa [#allocation4], 1 }
  0xb3   :  { %153 = vsyncpa [#allocation6], 1 }

// kernel: moe_feed_forward.3
= control target key start
LH: loop header
LB: loop body
LE: loop exit
PB: predicated region body
PF: predicated region fallthrough
CT: control target
= control target key end

     0   :  { %s980_s23 = smov [#allocation4]   ;;  %s1125_s0 = inlined_call_operand.vmem [shape: s32[10], index: 0, kind: input, shape index: {}]   ;;  %s1126_s1 = inlined_call_operand.<no memory space> [shape: s32[1], index: 1, kind: input, shape index: {}]   ;;  %s1127_s2 = inlined_call_operand.vmem [shape: bf16[160,128], index: 2, kind: input, shape index: {}]   ;;  %s1128_s3 = inlined_call_operand.vmem [shape: bf16[8,128,256], index: 3, kind: input, shape index: {}]   ;;  %s1129_s4 = inlined_call_operand.vmem [shape: bf16[8,128,128], index: 4, kind: input, shape index: {}]   ;;  %s1130_s5 = inlined_call_operand.vmem [shape: bf16[160,128], index: 5, kind: output, shape index: {}]  }
   0x1   :  { %s11_s20 = sshll.u32 %s1125_s0, 4  ;;  %15 = sst [smem:[#allocation5]] %s1126_s1  ;;  %s12_s20 = int_to_ptr.vmem [resolvable:$true] %s11_s20 }
   0x2   :  { %14 = dma.vmem_to_smem %s12_s20, 16, %s980_s23, [#allocation3] }
   0x3   :  { %966 = dma.done.wait [#allocation3], 16 }
   0x4   :  { %967 = vsyncadd [#allocation3], 4294967280 }
   0x5   :  { %18 = sfence }
   0x6   :  { %s1018_s24 = smov 0   ;;  %s1020_s25 = smov 0  }
   0x7   :  { %s1022_s26 = smov 0  }
   0x8 LB: > { %s36_s0 = sadd.s32 1, %s974_s25  ;;  %p757_p0 = scmp.ge.s32.totalorder %s978_s26, 1  ;;  %s978_s26 = sphi %s1022_s26, %s24_s26   ;;  %s974_s25 = sphi %s1020_s25, %s1132_s25   ;;  %s970_s24 = sphi %s1018_s24, %s1131_s24  }
   0x9   : > { %p38_p1 = scmp.ge.s32.totalorder %s36_s0, 10  ;;  %p251_p2 = scmp.lt.s32.totalorder %s978_s26, 11 }
   0xb   : > { %s1134_s0 = smov (%p38_p1, %s36_s0), 0  ;;  %p252_p3 = pnand %p757_p0, %p251_p2 }
   0xc   : > { %s1038_s1 = sld [smem:[#allocation5]] (!%p252_p3)  ;;  %s767_s27 = sshll.u32 (!%p252_p3), %s970_s24, 1 }
   0xd   : > { %255 = sbr.rel (%p252_p3) target bundleno = 397 (0x18d), region = 32  ;;  %p362_p4 = scmp.lt.s32.totalorder (!%p252_p3), %s767_s27, 19 }
  0x12   : > { %s1136_s27 = smov (!%p362_p4, %s767_s27), 19  ;;  %s758_s29 = sadd.s32 4294967295, %s1038_s1 }
  0x13   : > { %s768_s28 = sshll.u32 %s1136_s27, 2  ;;  %p309_p5 = scmp.lt.s32.totalorder %s970_s24, %s758_s29 }
  0x14   : > { %s1045_s7 = scalar_lea.vmem %s1130_s5, %s768_s28  ;;  %p368_p6 = scmp.lt.s32.totalorder %s970_s24, %s1038_s1 }
  0x15   : > { %s310_s8 = scalar_select %p309_p5, %s970_s24, %s758_s29  ;;  %v981_v0 = vmov (%p368_p6), 0.0  }
  0x16   : > { %374 = vst [vmem:[#allocation2] sm:$0xff] (%p368_p6), %v981_v0 }
  0x17   : > { %s759_s9 = sshll.u32 %s310_s8, 1  ;;  %s325_s10 = sld [smem:[#allocation4 + %s310_s8]]  ;;  %375 = vst [vmem:[#allocation2 + $0x8] sm:$0xff] (%p368_p6), %v981_v0 }
  0x18   : > { %p312_p7 = scmp.lt.s32.totalorder %s759_s9, 19  ;;  %s345_s11 = sld [smem:[#allocation4 + %s310_s8]] }
  0x1a   : > { %s1138_s9 = smov (!%p312_p7, %s759_s9), 19 }
  0x1b   : > { %s760_s12 = sshll.u32 %s1138_s9, 2 }
  0x1c   : > { %s1054_s15 = scalar_lea.vmem %s1127_s2, %s760_s12 }
  0x1d   : > { %p327_p8 = scmp.lt.s32.totalorder %s325_s10, 7 }
  0x1e   : > { %p347_p9 = scmp.lt.s32.totalorder %s345_s11, 7  ;;  %373 = sbr.rel (!%p368_p6) target bundleno = 35 (0x23), region = 36 }
  0x1f   : > { %s1140_s10 = smov (!%p327_p8, %s325_s10), 7 }
  0x20   : > { %s1142_s11 = smov (!%p347_p9, %s345_s11), 7  ;;  %s875_s16 = sshll.u32 %s1140_s10, 7 }
  0x21   : > { %s1059_s19 = scalar_lea.vmem %s1128_s3, %s875_s16  ;;  %s876_s20 = sshll.u32 %s1142_s11, 6 }
  0x22   : > { %s1064_s23 = scalar_lea.vmem %s1129_s4, %s876_s20 }
  0x23 PF: > { %p770_p10 = scmp.ge.s32.totalorder %s970_s24, %s1038_s1 }
  0x25   : > { %378 = sbr.rel (%p770_p10) target bundleno = 387 (0x183), region = 40 }
  0x2a   : > { %v833_v1 = vld [vmem:[%s1059_s19 + $0x70] sm:$0xf]  ;;  %v894_v2 = vld [vmem:[%s1059_s19 + $0x74] sm:$0xf0]  ;;  %v825_v3 = vld [vmem:[%s1059_s19 + $0x60] sm:$0xf] }
  0x2b   : > { %v834_v4 = vor.u32 %v894_v2, %v833_v1  ;;  %v892_v5 = vld [vmem:[%s1059_s19 + $0x64] sm:$0xf0]  ;;  %v817_v7 = vld [vmem:[%s1059_s19 + $0x50] sm:$0xf]  ;;  %v890_v8 = vld [vmem:[%s1059_s19 + $0x54] sm:$0xf0] }
  0x2c   : > { %v826_v6 = vor.u32 %v892_v5, %v825_v3  ;;  %v893_v9 = vld [vmem:[%s1059_s19 + $0x74] sm:$0xf]  ;;  %v835_v10 = vld [vmem:[%s1059_s19 + $0x78] sm:$0xf0]  ;;  %v891_v12 = vld [vmem:[%s1059_s19 + $0x64] sm:$0xf]  ;;  %v818_v14 = vor.u32 %v890_v8, %v817_v7 }
  0x2d   : > { %499 = vmatpush.bf16.msra.mxu0 %v834_v4  ;;  %v838_v11 = vor.u32 %v893_v9, %v835_v10  ;;  %v827_v13 = vld [vmem:[%s1059_s19 + $0x68] sm:$0xf0]  ;;  %v809_v15 = vld [vmem:[%s1059_s19 + $0x40] sm:$0xf]  ;;  %v888_v17 = vld [vmem:[%s1059_s19 + $0x44] sm:$0xf0] }
  0x2e   : > { %v830_v16 = vor.u32 %v891_v12, %v827_v13  ;;  %v889_v18 = vld [vmem:[%s1059_s19 + $0x54] sm:$0xf]  ;;  %v819_v19 = vld [vmem:[%s1059_s19 + $0x58] sm:$0xf0]  ;;  %v810_v20 = vor.u32 %v888_v17, %v809_v15  ;;  %v801_v21 = vld [vmem:[%s1059_s19 + $0x30] sm:$0xf] }
  0x2f   : > { %513 = vmatpush.bf16.msra.mxu1 %v838_v11  ;;  %v822_v22 = vor.u32 %v889_v18, %v819_v19  ;;  %v886_v23 = vld [vmem:[%s1059_s19 + $0x34] sm:$0xf0]  ;;  %v887_v24 = vld [vmem:[%s1059_s19 + $0x44] sm:$0xf]  ;;  %v811_v25 = vld [vmem:[%s1059_s19 + $0x48] sm:$0xf0] }
  0x30   : > { %v802_v26 = vor.u32 %v886_v23, %v801_v21  ;;  %v793_v27 = vld [vmem:[%s1059_s19 + $0x20] sm:$0xf]  ;;  %v814_v28 = vor.u32 %v887_v24, %v811_v25  ;;  %v884_v29 = vld [vmem:[%s1059_s19 + $0x24] sm:$0xf0]  ;;  %v885_v30 = vld [vmem:[%s1059_s19 + $0x34] sm:$0xf] }
  0x31   : > { %500 = vmatpush.bf16.msra.mxu0 %v826_v6  ;;  %v803_v31 = vld [vmem:[%s1059_s19 + $0x38] sm:$0xf0]  ;;  %v794_v32 = vor.u32 %v884_v29, %v793_v27  ;;  %v785_v33 = vld [vmem:[%s1059_s19 + $0x10] sm:$0xf]  ;;  %v882_v35 = vld [vmem:[%s1059_s19 + $0x14] sm:$0xf0] }
  0x32   : > { %v806_v34 = vor.u32 %v885_v30, %v803_v31  ;;  %v883_v36 = vld [vmem:[%s1059_s19 + $0x24] sm:$0xf]  ;;  %v795_v37 = vld [vmem:[%s1059_s19 + $0x28] sm:$0xf0]  ;;  %v786_v38 = vor.u32 %v882_v35, %v785_v33  ;;  %v777_v39 = vld [vmem:[%s1059_s19] sm:$0xf] }
  0x33   : > { %514 = vmatpush.bf16.msra.mxu1 %v830_v16  ;;  %v798_v40 = vor.u32 %v883_v36, %v795_v37  ;;  %v880_v41 = vld [vmem:[%s1059_s19 + $0x4] sm:$0xf0]  ;;  %v881_v42 = vld [vmem:[%s1059_s19 + $0x14] sm:$0xf]  ;;  %v787_v43 = vld [vmem:[%s1059_s19 + $0x18] sm:$0xf0] }
  0x34   : > { %v778_v44 = vor.u32 %v880_v41, %v777_v39  ;;  %v790_v45 = vor.u32 %v881_v42, %v787_v43  ;;  %v879_v46 = vld [vmem:[%s1059_s19 + $0x4] sm:$0xf]  ;;  %v779_v47 = vld [vmem:[%s1059_s19 + $0x8] sm:$0xf0]  ;;  %v902_v50 = vld [vmem:[%s1064_s23 + $0x38] sm:$0xff] }
  0x35   : > { %501 = vmatpush.bf16.msra.mxu0 %v818_v14  ;;  %v878_v48 = vld [vmem:[%s1054_s15] sm:$0xff]  ;;  %v782_v49 = vor.u32 %v879_v46, %v779_v47  ;;  %620 = vmatpush.bf16.msra.mxu2 %v902_v50  ;;  %v901_v51 = vld [vmem:[%s1064_s23 + $0x30] sm:$0xff]  ;;  %v900_v52 = vld [vmem:[%s1064_s23 + $0x28] sm:$0xff] }
  0x36   : > { %v899_v53 = vld [vmem:[%s1064_s23 + $0x20] sm:$0xff]  ;;  %v898_v54 = vld [vmem:[%s1064_s23 + $0x18] sm:$0xff]  ;;  %v897_v55 = vld [vmem:[%s1064_s23 + $0x10] sm:$0xff] }
  0x37   : > { %515 = vmatpush.bf16.msra.mxu1 %v822_v22  ;;  %v896_v58 = vld [vmem:[%s1064_s23 + $0x8] sm:$0xff]  ;;  %v895_v59 = vld [vmem:[%s1064_s23] sm:$0xff] }
  0x38   : > { %v569_v29 = vld [vmem:[#allocation2] sm:$0xff] }
  0x39   : > { %502 = vmatpush.bf16.msra.mxu0 %v810_v20  ;;  %621 = vmatpush.bf16.msra.mxu2 %v901_v51 }
  0x3b   : > { %516 = vmatpush.bf16.msra.mxu1 %v814_v28 }
  0x3d   : > { %503 = vmatpush.bf16.msra.mxu0 %v802_v26  ;;  %622 = vmatpush.bf16.msra.mxu2 %v900_v52 }
  0x3f   : > { %517 = vmatpush.bf16.msra.mxu1 %v806_v34 }
  0x41   : > { %504 = vmatpush.bf16.msra.mxu0 %v794_v32  ;;  %623 = vmatpush.bf16.msra.mxu2 %v899_v53  ;;  %v570_v32 = vld [vmem:[#allocation2 + $0x8] sm:$0xff] }
  0x43   : > { %518 = vmatpush.bf16.msra.mxu1 %v798_v40 }
  0x45   : > { %505 = vmatpush.bf16.msra.mxu0 %v786_v38  ;;  %624 = vmatpush.bf16.msra.mxu2 %v898_v54 }
  0x47   : > { %519 = vmatpush.bf16.msra.mxu1 %v790_v45 }
  0x49   : > { %506 = vmatpush.bf16.msra.mxu0 %v778_v44  ;;  %625 = vmatpush.bf16.msra.mxu2 %v897_v55 }
  0x4b   : > { %520 = vmatpush.bf16.msra.mxu1 %v782_v49 }
  0x4c   : > { %507 = vmatmul.bf16.vlgmr.msra.gmra.mxu0 %v878_v48 }
  0x4d   : > { %626 = vmatpush.bf16.msra.mxu2 %v896_v58 }
  0x4e   : > { %521 = vmatmul.bf16.vlgmr.msra.gmra.mxu1 %v878_v48 }
  0x51   : > { %627 = vmatpush.bf16.msra.mxu2 %v895_v59 }
  0xc9   : > { %v508_v56 = vpop.f32.mrf.mxu0 }
  0xca   : > { %v839_v57 = vmul.f32 -1.442695, %v508_v56 }
  0xcb   : > { %v522_v11 = vpop.f32.mrf.mxu1 }
  0xcc   : > { %934 = vpow2.f32 %v839_v57 }
  0xd1   : > { %v510_v60 = vpop.f32.mrf.mxu0 }
  0xd2   : > { %v935_v61 = vpop.eup %934  ;;  %v840_v62 = vmul.f32 -1.442695, %v510_v60 }
  0xd3   : > { %v533_v63 = vadd.f32 1.0, %v935_v61  ;;  %v524_v25 = vpop.f32.mrf.mxu1 }
  0xd4   : > { %936 = vpow2.f32 %v840_v62 }
  0xd5   : > { %938 = vrcp.f32 %v533_v63  ;;  %v546_v8 = vand.u32 2147483648, %v533_v63  ;;  %vm540_vm1 = vweird.f32 %v533_v63  ;;  %v544_v9 = vand.u32 2147483647, %v533_v63 }
  0xd7   : > { %v547_v14 = vor.u32 1.1754944e-38, %v546_v8  ;;  %vm545_vm3 = vcmp.eq.f32.partialorder %v544_v9, 8.507059e+37 }
  0xda   : > { %v937_v0 = vpop.eup %936 }
  0xdb   : > { %v939_v1 = vpop.eup %938  ;;  %v534_v2 = vadd.f32 1.0, %v937_v0 }
  0xdc   : > { %v536_v3 = vmul.f32 %v939_v1, %v533_v63  ;;  %vm541_vm0 = vweird.f32 %v939_v1 }
  0xdd   : > { %940 = vrcp.f32 %v534_v2  ;;  %vm542_vm2 = vmor %vm540_vm1, %vm541_vm0  ;;  %v561_v15 = vand.u32 2147483648, %v534_v2  ;;  %v559_v17 = vand.u32 2147483647, %v534_v2  ;;  %vm555_vm5 = vweird.f32 %v534_v2 }
  0xde   : > { %v537_v4 = vsub.f32 1.0, %v536_v3 }
  0xdf   : > { %v562_v20 = vor.u32 1.1754944e-38, %v561_v15  ;;  %vm560_vm7 = vcmp.eq.f32.partialorder %v559_v17, 8.507059e+37 }
  0xe0   : > { %v538_v5 = vmul.f32 %v939_v1, %v537_v4 }
  0xe2   : > { %v539_v6 = vadd.f32 %v939_v1, %v538_v5 }
  0xe3   : > { %v941_v7 = vpop.eup %940 }
  0xe4   : > { %v551_v10 = vmul.f32 %v941_v7, %v534_v2  ;;  %v543_v12 = vsel %vm542_vm2, %v939_v1, %v539_v6  ;;  %vm556_vm4 = vweird.f32 %v941_v7 }
  0xe5   : > { %v548_v18 = vsel %vm545_vm3, %v547_v14, %v543_v12  ;;  %vm557_vm6 = vmor %vm555_vm5, %vm556_vm4 }
  0xe6   : > { %v552_v13 = vsub.f32 1.0, %v551_v10  ;;  %v565_v21 = vmul.f32 %v548_v18, %v508_v56 }
  0xe8   : > { %v553_v16 = vmul.f32 %v941_v7, %v552_v13  ;;  %v567_v26 = vmul.f32 %v565_v21, %v522_v11 }
  0xea   : > { %v554_v19 = vadd.f32 %v941_v7, %v553_v16 }
  0xec   : > { %v558_v22 = vsel %vm557_vm6, %v941_v7, %v554_v19 }
  0xed   : > { %v563_v23 = vsel %vm560_vm7, %v562_v20, %v558_v22 }
  0xee   : > { %v566_v24 = vmul.f32 %v563_v23, %v510_v60 }
  0xf0   : > { %v568_v27 = vmul.f32 %v566_v24, %v524_v25 }
  0xf2   : > { %v571_v28 = vpack.c.bf16 %v568_v27, %v567_v26 }
  0xf4   : > { %628 = vmatmul.bf16.vlgmr.msra.gmra.mxu2 %v571_v28 }
 0x177   : > { %v629_v30 = vpop.f32.mrf.mxu2 }
 0x178   : > { %v634_v31 = vadd.f32 %v629_v30, %v569_v29 }
 0x17a   : > { %636 = vst [vmem:[#allocation2] sm:$0xff] %v634_v31 }
 0x17f   : > { %v631_v33 = vpop.f32.mrf.mxu2 }
 0x180   : > { %v635_v34 = vadd.f32 %v631_v33, %v570_v32 }
 0x182   : > { %637 = vst [vmem:[#allocation2 + $0x8] sm:$0xff] %v635_v34 }
 0x183 PF: > { %639 = sbr.rel (!%p368_p6) target bundleno = 397 (0x18d), region = 44  ;;  %v640_v35 = vld [vmem:[#allocation2] sm:$0xff] (%p368_p6) }
 0x189   : > { %v641_v36 = vld [vmem:[#allocation2 + $0x8] sm:$0xff] }
 0x18a   : > { %v906_v37 = vpack.c.bf16 %v641_v36, %v640_v35 }
 0x18c   : > { %907 = vst [vmem:[%s1045_s7] sm:$0xff] %v906_v37  }
 0x18d PF: > { %s24_s26 = sadd.s32 1, %s978_s26   ;;  %s1131_s24 = smov %s974_s25 }
 0x18e   : > { %p21_p11 = scmp.ge.s32.totalorder %s24_s26, 12   ;;  %s1132_s25 = smov %s1134_s0 }
 0x190   :  { %23 = sbr.rel (!%p21_p11) target bundleno = 8 (0x8), region = 80 }

</bundles_post_ra>
